<compile_context>
chip_gen: v5e
topology: v5e:2x2
jax: 0.10.0
libtpu: 0.0.40
codegen_flags: <defaults>
</compile_context>

<pallas_src>
import functools

import jax
import jax.numpy as jnp
from jax.experimental import pallas as pl
from jax.experimental.pallas import tpu as pltpu


# y = clamp(x * scale + shift, 0, 1) reproduces the PyTorch input_range handling
# followed by .clamp(0, 1).
_RANGE_AFFINE = {
    "tanh": (0.5, 0.5),           # (x + 1) / 2
    "uint8": (1.0 / 255.0, 0.0),  # x / 255
    "sigmoid": (1.0, 0.0),        # identity
}


def _sq_err_partial_kernel(f_ref, r_ref, o_ref, *, lo, hi, tile_rows, rows, ragged):
    """One grid step: partial sum of (clip(f)-clip(r))^2 over a (tile_rows, L) block.

    The affine is folded into the clip bounds; the squared-error sum is rescaled by
    scale^2 once in the JAX epilogue.  The scalar partial is broadcast into a
    lane-dense (1, 8, 128) output block (unmasked full-vreg store).
    """
    a = f_ref[...]
    b = r_ref[...]
    if a.dtype != jnp.float32:
        # Integer (uint8) inputs must be upcast before arithmetic; bf16 is upcast too
        # (see TODO above) -- the cast happens in VMEM, HBM still streams native bytes.
        a = a.astype(jnp.float32)
        b = b.astype(jnp.float32)
    d = jnp.clip(a, lo, hi) - jnp.clip(b, lo, hi)
    if ragged:  # static Python check: only emitted when rows % tile_rows != 0
        valid_rows = rows - pl.program_id(0) * tile_rows
        row_idx = jax.lax.broadcasted_iota(jnp.int32, d.shape, 0)
        d = jnp.where(row_idx < valid_rows, d, 0.0)
    s = jnp.sum(d * d)
    o_ref[...] = s * jnp.ones(o_ref.shape, jnp.float32)


def _psnr_reference(fake_image, real_image, input_range="tanh", eps=1e-6):
    """Pure-JAX reference mirroring the PyTorch module's default path.

    Also used as the fast path for tiny / lane-unfriendly inputs, where kernel launch
    and layout plumbing would dominate a fused XLA elementwise+reduce.
    """
    scale, shift = _RANGE_AFFINE[input_range]
    a = jnp.clip(fake_image.astype(jnp.float32) * scale + shift, 0.0, 1.0)
    b = jnp.clip(real_image.astype(jnp.float32) * scale + shift, 0.0, 1.0)
    mse = jnp.mean((a - b) ** 2)
    mask_mean = jnp.float32(1.0)  # mask=None -> ones_like(fake).mean() == 1
    return -10.0 * jnp.log10((mse + jnp.float32(eps)) / mask_mean)


def psnr_metric(fake_image, real_image, *, input_range="tanh", eps=1e-6,
                block_rows=1024, lane_width=512, min_kernel_elems=1024):
    """PSNRMetric.forward with defaults (batch_reduction=True, mask=None,
    color_shift_elimination=False).  Inputs: any shape (e.g. NCHW), same for both."""
    if input_range not in _RANGE_AFFINE:
        raise ValueError(
            f'Unsupported input_range={input_range}. Use "sigmoid", "tanh" or "uint8".')
    scale, shift = _RANGE_AFFINE[input_range]
    assert fake_image.shape == real_image.shape
    assert lane_width % 128 == 0

    total = int(fake_image.size)  # static Python int

    # Small-input / non-lane-aligned fast path: avoids a kernel launch and any
    # pad copy; a fused XLA elementwise+reduce is faster there.
    if total < min_kernel_elems or total % 128 != 0:
        return _psnr_reference(fake_image, real_image, input_range=input_range, eps=eps)

    # Lane width: largest multiple of 128 (halving from lane_width) that divides total,
    # so the flatten->2D reshape is a free contiguous reshape (no pad, no copy).
    L = int(lane_width)
    while total % L != 0:
        L //= 2
    rows = total // L

    f2 = jnp.reshape(fake_image, (rows, L))   # native dtype, no copy
    r2 = jnp.reshape(real_image, (rows, L))

    tm = int(block_rows)
    if rows < tm:
        # Shrink the tile for small inputs; round to 32 sublanes (covers 8/16/32-bit
        # packing constraints).
        tm = max(32, -(-rows // 32) * 32)
    grid = (pl.cdiv(rows, tm),)
    ragged = (rows % tm) != 0

    # Fold the affine into the clamp bounds; apply scale^2 once in the epilogue.
    lo = (0.0 - shift) / scale
    hi = (1.0 - shift) / scale

    kernel = functools.partial(_sq_err_partial_kernel, lo=float(lo), hi=float(hi),
                               tile_rows=tm, rows=rows, ragged=ragged)
    partials = pl.pallas_call(
        kernel,
        out_shape=jax.ShapeDtypeStruct((grid[0], 8, 128), jnp.float32),
        grid=grid,
        in_specs=[pl.BlockSpec((tm, L), lambda i: (i, 0)),
                  pl.BlockSpec((tm, L), lambda i: (i, 0))],
        out_specs=pl.BlockSpec((1, 8, 128), lambda i: (i, 0, 0)),
        # Single fully-parallel axis -> v7x megacore can shard blocks across both TCs.
        compiler_params=pltpu.CompilerParams(dimension_semantics=("parallel",)),
    )(f2, r2)

    # Each block's partial is replicated across its (8, 128) output tile: contiguous
    # reduce over the whole buffer, then divide by the exact power-of-two replication.
    sq_err_sum = jnp.sum(partials) * (1.0 / (8 * 128))
    mse = sq_err_sum * jnp.float32(scale * scale) / jnp.float32(total)
    mask_mean = jnp.float32(1.0)  # mask=None -> ones_like(fake).mean() == 1
    return -10.0 * jnp.log10((mse + jnp.float32(eps)) / mask_mean)


if __name__ == "__main__":
    key = jax.random.PRNGKey(0)
    kf, kr = jax.random.split(key)
    checks = []

    # 1) Small NCHW f32 images in tanh range (single-block kernel path).
    fake = jnp.tanh(jax.random.normal(kf, (2, 4, 16, 16), jnp.float32))
    real = jnp.tanh(jax.random.normal(kr, (2, 4, 16, 16), jnp.float32))
    out = jax.jit(psnr_metric)(fake, real)
    jax.block_until_ready(out)
    assert out.shape == () and out.dtype == jnp.float32
    checks.append((out, _psnr_reference(fake, real)))

    # 2) bf16 inputs streamed at native dtype, ragged row tail masked in-kernel.
    fake16 = jnp.tanh(jax.random.normal(kf, (2, 3, 32, 32), jnp.float32)).astype(jnp.bfloat16)
    real16 = jnp.tanh(jax.random.normal(kr, (2, 3, 32, 32), jnp.float32)).astype(jnp.bfloat16)
    out16 = jax.jit(psnr_metric)(fake16, real16)
    jax.block_until_ready(out16)
    checks.append((out16, _psnr_reference(fake16, real16)))

    # 3) Multi-block grid (block_rows=32 -> grid of 2) with a ragged last block.
    fake3 = jnp.tanh(jax.random.normal(kf, (2, 3, 64, 64), jnp.float32))
    real3 = jnp.tanh(jax.random.normal(kr, (2, 3, 64, 64), jnp.float32))
    out3 = jax.jit(functools.partial(psnr_metric, block_rows=32))(fake3, real3)
    jax.block_until_ready(out3)
    checks.append((out3, _psnr_reference(fake3, real3)))

    # 4) 'uint8' input range (0..255 valued floats) exercising the folded clip bounds.
    fake_u = jnp.floor(jax.random.uniform(kf, (1, 3, 32, 32), jnp.float32) * 255.0)
    real_u = jnp.floor(jax.random.uniform(kr, (1, 3, 32, 32), jnp.float32) * 255.0)
    out_u = jax.jit(functools.partial(psnr_metric, input_range="uint8"))(fake_u, real_u)
    jax.block_until_ready(out_u)
    checks.append((out_u, _psnr_reference(fake_u, real_u, input_range="uint8")))

    for got, want in checks:
        assert jnp.allclose(got, want, rtol=1e-4, atol=1e-4), (got, want)
    print("KERNEL_OK")
</pallas_src>

<mosaic_0001>
module attributes {stable_mosaic.version = 11 : i64} {
  func.func @_sq_err_partial_kernel(%arg0: i32, %arg1: memref<32x512xf32, #tpu.memory_space<vmem>>, %arg2: memref<32x512xf32, #tpu.memory_space<vmem>>, %arg3: memref<1x8x128xf32, #tpu.memory_space<vmem>>) attributes {dimension_semantics = [#tpu.dimension_semantics<parallel>], iteration_bounds = array<i64: 1>, scalar_prefetch = 0 : i64, scratch_operands = 0 : i64, tpu.core_type = #tpu.core_type<tc>, window_params = [{transform_indices = @transform_0, window_bounds = array<i64: 32, 512>}, {transform_indices = @transform_1, window_bounds = array<i64: 32, 512>}, {transform_indices = @transform_2, window_bounds = array<i64: 1, 8, 128>}]} {
    %c0 = arith.constant 0 : index
    %c0_0 = arith.constant 0 : index
    %0 = vector.load %arg1[%c0, %c0_0] : memref<32x512xf32, #tpu.memory_space<vmem>>, vector<32x512xf32>
    %c0_1 = arith.constant 0 : index
    %c0_2 = arith.constant 0 : index
    %1 = vector.load %arg2[%c0_1, %c0_2] : memref<32x512xf32, #tpu.memory_space<vmem>>, vector<32x512xf32>
    %cst = arith.constant -1.000000e+00 : f32
    %cst_3 = arith.constant 1.000000e+00 : f32
    %2 = vector.broadcast %cst : f32 to vector<32x512xf32>
    %3 = arith.maximumf %2, %0 : vector<32x512xf32>
    %4 = vector.broadcast %cst_3 : f32 to vector<32x512xf32>
    %5 = arith.minimumf %4, %3 : vector<32x512xf32>
    %cst_4 = arith.constant -1.000000e+00 : f32
    %cst_5 = arith.constant 1.000000e+00 : f32
    %6 = vector.broadcast %cst_4 : f32 to vector<32x512xf32>
    %7 = arith.maximumf %6, %1 : vector<32x512xf32>
    %8 = vector.broadcast %cst_5 : f32 to vector<32x512xf32>
    %9 = arith.minimumf %8, %7 : vector<32x512xf32>
    %10 = arith.subf %5, %9 : vector<32x512xf32>
    %c32_i32 = arith.constant 32 : i32
    %11 = arith.muli %arg0, %c32_i32 : i32
    %c4_i32 = arith.constant 4 : i32
    %12 = arith.subi %c4_i32, %11 : i32
    %13 = tpu.iota {dimensions = array<i32: 0>} : vector<32x512xi32>
    %14 = vector.broadcast %12 : i32 to vector<32x512xi32>
    %15 = arith.cmpi slt, %13, %14 : vector<32x512xi32>
    %cst_6 = arith.constant 0.000000e+00 : f32
    %16 = vector.broadcast %cst_6 : f32 to vector<32x512xf32>
    %17 = arith.select %15, %10, %16 : vector<32x512xi1>, vector<32x512xf32>
    %18 = arith.mulf %17, %17 : vector<32x512xf32>
    %19 = vector.shape_cast %18 : vector<32x512xf32> to vector<1x32x512xf32>
    %cst_7 = arith.constant dense<0.000000e+00> : vector<1xf32>
    %20 = vector.multi_reduction <add>, %19, %cst_7 [1, 2] : vector<1x32x512xf32> to vector<1xf32>
    %21 = vector.shape_cast %20 : vector<1xf32> to vector<1x1x1xf32>
    %22 = vector.extract %21[0, 0, 0] : f32 from vector<1x1x1xf32>
    %cst_8 = arith.constant 1.000000e+00 : f32
    %23 = vector.broadcast %cst_8 : f32 to vector<1x8x128xf32>
    %24 = vector.broadcast %22 : f32 to vector<1x8x128xf32>
    %25 = arith.mulf %24, %23 : vector<1x8x128xf32>
    %c0_9 = arith.constant 0 : index
    %c0_10 = arith.constant 0 : index
    %c0_11 = arith.constant 0 : index
    %26 = vector.load %arg3[%c0_9, %c0_10, %c0_11] : memref<1x8x128xf32, #tpu.memory_space<vmem>>, vector<1x8x128xf32>
    tpu.vector_store %arg3[%c0_9, %c0_10, %c0_11], %25 {strides = array<i32>} : memref<1x8x128xf32, #tpu.memory_space<vmem>>, vector<1x8x128xf32>,
    return
  }
  func.func @transform_0(%arg0: i32) -> (i32, i32) {
    %c0_i32 = arith.constant 0 : i32
    %c0_i32_0 = arith.constant 0 : i32
    return %arg0, %c0_i32 : i32, i32
  }
  func.func @transform_1(%arg0: i32) -> (i32, i32) {
    %c0_i32 = arith.constant 0 : i32
    %c0_i32_0 = arith.constant 0 : i32
    return %arg0, %c0_i32 : i32, i32
  }
  func.func @transform_2(%arg0: i32) -> (i32, i32, i32) {
    %c0_i32 = arith.constant 0 : i32
    %c0_i32_0 = arith.constant 0 : i32
    %c0_i32_1 = arith.constant 0 : i32
    return %arg0, %c0_i32, %c0_i32_0 : i32, i32, i32
  }
}

</mosaic_0001>

<bundles_post_ra>
// kernel: psnr_metric.1
= control target key start
LH: loop header
LB: loop body
LE: loop exit
PB: predicated region body
PF: predicated region fallthrough
CT: control target
= control target key end

     0   :  { %v125_v23 = vlaneseq  ;;  %s368_s0 = inlined_call_operand.vmem [shape: f32[4,512], index: 0, kind: input, shape index: {}]   ;;  %s369_s1 = inlined_call_operand.vmem [shape: f32[4,512], index: 1, kind: input, shape index: {}]   ;;  %s370_s2 = inlined_call_operand.vmem [shape: f32[1,8,128], index: 2, kind: output, shape index: {}]  }
   0x1   :  { %v11_v0 = vld [vmem:[%s368_s0] sm:$0xff]  ;;  %v12_v1 = vld [vmem:[%s368_s0 + $0x8] sm:$0xff]  ;;  %v13_v2 = vld [vmem:[%s368_s0 + $0x10] sm:$0xff] }
   0x2   :  { %v14_v3 = vld [vmem:[%s368_s0 + $0x18] sm:$0xff]  ;;  %v268_v4 = vclamps-f32 %v11_v0, 1.0  ;;  %v27_v5 = vld [vmem:[%s369_s1] sm:$0xff]  ;;  %v28_v6 = vld [vmem:[%s369_s1 + $0x8] sm:$0xff]  ;;  %v269_v7 = vclamps-f32 %v12_v1, 1.0  ;;  %v270_v8 = vclamps-f32 %v13_v2, 1.0 }
   0x3   :  { %v271_v9 = vclamps-f32 %v14_v3, 1.0  ;;  %v29_v10 = vld [vmem:[%s369_s1 + $0x10] sm:$0xff]  ;;  %v30_v11 = vld [vmem:[%s369_s1 + $0x18] sm:$0xff]  ;;  %v284_v12 = vclamps-f32 %v27_v5, 1.0  ;;  %v285_v13 = vclamps-f32 %v28_v6, 1.0  ;;  %v19_v16 = vld [vmem:[%s368_s0 + $0x40] sm:$0xff] }
   0x4   :  { %v286_v14 = vclamps-f32 %v29_v10, 1.0  ;;  %v287_v15 = vclamps-f32 %v30_v11, 1.0  ;;  %v35_v18 = vld [vmem:[%s369_s1 + $0x40] sm:$0xff]  ;;  %v20_v20 = vld [vmem:[%s368_s0 + $0x48] sm:$0xff]  ;;  %v21_v21 = vld [vmem:[%s368_s0 + $0x50] sm:$0xff]  ;;  %v276_v26 = vclamps-f32 %v19_v16, 1.0 }
   0x5   :  { %v107_v17 = vsub.f32 %v268_v4, %v284_v12  ;;  %v108_v19 = vsub.f32 %v269_v7, %v285_v13  ;;  %v22_v24 = vld [vmem:[%s368_s0 + $0x58] sm:$0xff]  ;;  %v37_v25 = vld [vmem:[%s369_s1 + $0x50] sm:$0xff]  ;;  %v36_v28 = vld [vmem:[%s369_s1 + $0x48] sm:$0xff]  ;;  %v292_v29 = vclamps-f32 %v35_v18, 1.0  ;;  %v277_v31 = vclamps-f32 %v20_v20, 1.0 }
   0x6   :  { %v109_v22 = vsub.f32 %v270_v8, %v286_v14  ;;  %v110_v27 = vsub.f32 %v271_v9, %v287_v15  ;;  %v38_v30 = vld [vmem:[%s369_s1 + $0x58] sm:$0xff]  ;;  %v278_v32 = vclamps-f32 %v21_v21, 1.0  ;;  %v279_v33 = vclamps-f32 %v22_v24, 1.0 }
   0x7   :  { %151 = vst [vmem:[#allocation1] ss:$2 sm:$0xff] %v107_v17  ;;  %v294_v34 = vclamps-f32 %v37_v25, 1.0  ;;  %v126_v35 = vshrl.u32 %v125_v23, 7  ;;  %v293_v36 = vclamps-f32 %v36_v28, 1.0  ;;  %v295_v37 = vclamps-f32 %v38_v30, 1.0 }
   0x8   :  { %153 = vst [vmem:[#allocation1 + $0x1] ss:$2 sm:$0xff] %v109_v22  ;;  %v115_v38 = vsub.f32 %v276_v26, %v292_v29 }
   0x9   :  { %155 = vst [vmem:[#allocation1 + $0x10] ss:$2 sm:$0xff] %v108_v19  ;;  %vm131_vm0 = vcmp.lt.s32.totalorder %v126_v35, 4  ;;  %v117_v39 = vsub.f32 %v278_v32, %v294_v34  ;;  %v116_v40 = vsub.f32 %v277_v31, %v293_v36  ;;  %v118_v43 = vsub.f32 %v279_v33, %v295_v37 }
   0xa   :  { %157 = vst [vmem:[#allocation1 + $0x11] ss:$2 sm:$0xff] %v110_v27 }
   0xf   :  { %v166_v41 = vld.sshfl [vmem:[#allocation1] sm:$0xff pattern:$0x75316420]  ;;  %v167_v42 = vld.sshfl [vmem:[#allocation1 + $0x8] sm:$0xff pattern:$0x75316420] }
  0x10   :  { %174 = vst [vmem:[#allocation1] ss:$2 sm:$0xff] %v115_v38  ;;  %v206_v44 = vsel %vm131_vm0, %v166_v41, 0.0  ;;  %v207_v45 = vsel %vm131_vm0, %v167_v42, 0.0 }
  0x11   :  { %v168_v46 = vld.sshfl [vmem:[#allocation1 + $0x10] sm:$0xff pattern:$0x75316420]  ;;  %v169_v47 = vld.sshfl [vmem:[#allocation1 + $0x18] sm:$0xff pattern:$0x75316420]  ;;  %v222_v48 = vmul.f32 %v206_v44, %v206_v44  ;;  %v223_v49 = vmul.f32 %v207_v45, %v207_v45 }
  0x12   :  { %175 = vst [vmem:[#allocation1 + $0x1] ss:$2 sm:$0xff] %v117_v39  ;;  %v208_v50 = vsel %vm131_vm0, %v168_v46, 0.0  ;;  %v209_v51 = vsel %vm131_vm0, %v169_v47, 0.0 }
  0x13   :  { %176 = vst [vmem:[#allocation1 + $0x10] ss:$2 sm:$0xff] %v116_v40  ;;  %v224_v52 = vmul.f32 %v208_v50, %v208_v50  ;;  %v225_v53 = vmul.f32 %v209_v51, %v209_v51  ;;  %v238_v54 = vadd.f32 %v223_v49, %v222_v48 }
  0x14   :  { %177 = vst [vmem:[#allocation1 + $0x11] ss:$2 sm:$0xff] %v118_v43 }
  0x15   :  { %v239_v55 = vadd.f32 %v238_v54, %v224_v52 }
  0x17   :  { %v240_v56 = vadd.f32 %v239_v55, %v225_v53 }
  0x19   :  { %253 = vadd.xlane.f32.xlu0 %v240_v56 }
  0x8c   :  { %v254_v57 = vpop.xlane.xlu0 %253 }
  0x8d   :  { %v255_v58 = vrot.slane %v254_v57, 4 }
  0x8f   :  { %v256_v59 = vadd.f32 %v255_v58, %v254_v57 }
  0x91   :  { %v257_v60 = vrot.slane %v256_v59, 2 }
  0x93   :  { %v258_v61 = vadd.f32 %v257_v60, %v256_v59 }
  0x95   :  { %v259_v62 = vrot.slane %v258_v61, 1 }
  0x97   :  { %v260_v63 = vadd.f32 %v259_v62, %v258_v61 }
  0x99   :  { %300 = vpush %v260_v63 }
  0xca   :  { %s301_s0 = spop %300 }
  0xcb   :  { %v262_v0 = vstv %s301_s0 }
  0xcc   :  { %263 = vst [vmem:[%s370_s2] sm:$0xff] %v262_v0 }

</bundles_post_ra>
